<compile_context>
chip_gen: v7x
topology: tpu7x:2x2x1
jax: 0.10.0
libtpu: 0.0.40
codegen_flags: <defaults>
</compile_context>

<pallas_src>
import functools

import numpy as np
import jax
import jax.numpy as jnp
from jax import lax
from jax.experimental import pallas as pl
from jax.experimental.pallas import tpu as pltpu


def _embedding_kernel(ids_ref, tab_ref, pos_ref, *rest,
                      seq_len, tile_n, drop_rate, keep_threshold):
    """One grid step handles one token row.

    ids_ref  : (N,) int32 in SMEM (scalar prefetch; consumed by the index_maps)
    tab_ref  : (1, 1, D) gathered embedding row (data-dependent BlockSpec)
    pos_ref  : (S, D) resident positional-encoding table
    bits_ref : (TILE_N, D) uint32 dropout bits for this tile (only if p > 0)
    o_ref    : (TILE_N, D) output tile (revisited across the inner axis)
    """
    del ids_ref  # only used by the index_maps
    if drop_rate > 0.0:
        bits_ref, o_ref = rest
    else:
        (o_ref,) = rest

    t = pl.program_id(0)                     # tile index
    j = pl.program_id(1)                     # row within tile
    n = t * tile_n + j                       # flattened (b * S + s) row
    pos_row = lax.rem(n, seq_len)            # position within the sequence

    tok = tab_ref[0]                         # (1, D) gathered embedding row
    pos = pos_ref[pl.ds(pos_row, 1), :]      # (1, D)
    y = tok + pos

    if drop_rate > 0.0:
        bits = bits_ref[pl.ds(j, 1), :]      # (1, D) uint32
        scale = jnp.float32(1.0 / (1.0 - drop_rate))
        keep = jnp.where(bits >= jnp.uint32(keep_threshold),
                         scale, jnp.float32(0.0))
        y = y * keep

    o_ref[pl.ds(j, 1), :] = y.astype(o_ref.dtype)


def _pick_tile_n(n, target=512):
    """Largest multiple-of-8 divisor of n that is <= target; falls back to the
    largest divisor <= target (which is n itself whenever n <= target)."""
    cands = [t for t in range(8, min(n, target) + 1, 8) if n % t == 0]
    if cands:
        return max(cands)
    return max(t for t in range(1, min(n, target) + 1) if n % t == 0)


def embedding_forward(ids, emb_table, pos_encoding, *, drop_rate=0.0,
                      dropout_key=None, tile_n=None):
    """ids: (B, S) int32 token indices; emb_table: (V, D) f32;
       pos_encoding: (max_len, D) f32.  Returns (B, S, D) f32."""
    B, S = ids.shape
    V, D = emb_table.shape
    N = B * S

    if not (0.0 <= float(drop_rate) < 1.0):
        raise ValueError("drop_rate must be in [0, 1)")
    if drop_rate > 0.0 and dropout_key is None:
        raise ValueError("dropout_key is required when drop_rate > 0")

    tile_n = _pick_tile_n(N) if tile_n is None else int(tile_n)
    assert N % tile_n == 0

    # Glue: flatten + clamp ids (nn.Embedding would raise on OOB; we clamp so
    # the DMA gather never reads an arbitrary row).
    ids_flat = jnp.clip(ids.reshape(N).astype(jnp.int32), 0, V - 1)
    # Table as (V, 1, D): each gathered block's last two dims equal the full
    # array dims, satisfying the TPU tiling constraint.
    tab3 = emb_table.astype(jnp.float32).reshape(V, 1, D)
    pos = pos_encoding[:S, :].astype(jnp.float32)            # (S, D), resident

    grid = (N // tile_n, tile_n)

    in_specs = [
        # Gathered embedding row: ids drive the block index (data-dependent).
        pl.BlockSpec((1, 1, D), lambda t, j, ids: (ids[t * tile_n + j], 0, 0)),
        # Positional table: one constant block, fetched once, kept resident.
        pl.BlockSpec((S, D), lambda t, j, ids: (0, 0)),
    ]
    operands = [tab3, pos]

    keep_threshold = 0
    if drop_rate > 0.0:
        bits = jax.random.bits(dropout_key, (N, D), dtype=jnp.uint32)
        in_specs.append(pl.BlockSpec((tile_n, D), lambda t, j, ids: (t, 0)))
        operands.append(bits)
        keep_threshold = min(int(round(float(drop_rate) * (2 ** 32))),
                             2 ** 32 - 1)

    kernel = functools.partial(
        _embedding_kernel, seq_len=S, tile_n=tile_n,
        drop_rate=float(drop_rate), keep_threshold=keep_threshold)

    out = pl.pallas_call(
        kernel,
        out_shape=jax.ShapeDtypeStruct((N, D), jnp.float32),
        grid_spec=pltpu.PrefetchScalarGridSpec(
            num_scalar_prefetch=1,
            grid=grid,
            in_specs=in_specs,
            out_specs=pl.BlockSpec((tile_n, D), lambda t, j, ids: (t, 0)),
        ),
        compiler_params=pltpu.CompilerParams(
            dimension_semantics=("parallel", "arbitrary")),
    )(ids_flat, *operands)

    return out.reshape(B, S, D)


def make_params(vocab_size, d_model, max_len, key):
    # nn.Embedding default init ~ N(0, 1); TokenEmbedding uses padding_idx=1.
    emb = jax.random.normal(key, (vocab_size, d_model), dtype=jnp.float32)
    emb = emb.at[1].set(0.0)
    # Sinusoidal positional encoding (non-trainable buffer).
    pos = jnp.arange(max_len, dtype=jnp.float32)[:, None]
    two_i = jnp.arange(0, d_model, 2, dtype=jnp.float32)
    angle = pos / jnp.power(10000.0, two_i / d_model)
    pe = jnp.zeros((max_len, d_model), dtype=jnp.float32)
    pe = pe.at[:, 0::2].set(jnp.sin(angle))
    pe = pe.at[:, 1::2].set(jnp.cos(angle))
    return emb, pe


if __name__ == "__main__":
    # Small shapes; d_model = 128 keeps the output tile lane-dense.
    vocab_size, d_model, max_len = 64, 128, 16
    B, S = 2, 8
    drop_rate = 0.1

    key = jax.random.PRNGKey(0)
    k_emb, k_ids, k_drop = jax.random.split(key, 3)
    emb_table, pos_encoding = make_params(vocab_size, d_model, max_len, k_emb)
    ids = jax.random.randint(k_ids, (B, S), 0, vocab_size, dtype=jnp.int32)

    # Pure-JAX reference (dropout off).
    ref = emb_table[ids] + pos_encoding[:S][None, :, :]

    out_nodrop = embedding_forward(ids, emb_table, pos_encoding, drop_rate=0.0)
    jax.block_until_ready(out_nodrop)
    np.testing.assert_allclose(np.asarray(out_nodrop), np.asarray(ref),
                               rtol=1e-5, atol=1e-5)

    # Training-mode dropout: every surviving element must equal ref / (1 - p).
    out = embedding_forward(ids, emb_table, pos_encoding,
                            drop_rate=drop_rate, dropout_key=k_drop)
    jax.block_until_ready(out)
    assert out.shape == (B, S, d_model) and out.dtype == jnp.float32
    out_np, ref_np = np.asarray(out), np.asarray(ref)
    kept = out_np != 0.0
    np.testing.assert_allclose(out_np[kept],
                               (ref_np / (1.0 - drop_rate))[kept],
                               rtol=1e-5, atol=1e-5)

    print("KERNEL_OK")
</pallas_src>

<mosaic_0001>
module attributes {stable_mosaic.version = 11 : i64} {
  func.func @_embedding_kernel(%arg0: i32, %arg1: i32, %arg2: memref<16xi32, #tpu.memory_space<smem>>, %arg3: memref<1x1x128xf32, #tpu.memory_space<vmem>>, %arg4: memref<8x128xf32, #tpu.memory_space<vmem>>, %arg5: memref<16x128xf32, #tpu.memory_space<vmem>>) attributes {dimension_semantics = [#tpu.dimension_semantics<parallel>, #tpu.dimension_semantics<arbitrary>], iteration_bounds = array<i64: 1, 16>, scalar_prefetch = 1 : i64, scratch_operands = 0 : i64, tpu.core_type = #tpu.core_type<tc>, window_params = [{transform_indices = @transform_0, window_bounds = array<i64: 1, 1, 128>}, {pipeline_mode = #tpu.pipeline_mode<synchronous>, transform_indices = @transform_1, window_bounds = array<i64: 8, 128>}, {transform_indices = @transform_2, window_bounds = array<i64: 16, 128>}]} {
    %c16_i32 = arith.constant 16 : i32
    %0 = arith.muli %arg0, %c16_i32 : i32
    %1 = arith.addi %0, %arg1 : i32
    %c8_i32 = arith.constant 8 : i32
    %2 = arith.remsi %1, %c8_i32 : i32
    %c0 = arith.constant 0 : index
    %c0_0 = arith.constant 0 : index
    %c0_1 = arith.constant 0 : index
    %3 = vector.load %arg3[%c0, %c0_0, %c0_1] : memref<1x1x128xf32, #tpu.memory_space<vmem>>, vector<1x1x128xf32>
    %4 = vector.shape_cast %3 : vector<1x1x128xf32> to vector<1x128xf32>
    %5 = arith.index_cast %2 : i32 to index
    %c0_2 = arith.constant 0 : index
    %6 = vector.load %arg4[%5, %c0_2] : memref<8x128xf32, #tpu.memory_space<vmem>>, vector<1x128xf32>
    %7 = arith.addf %4, %6 : vector<1x128xf32>
    %8 = arith.index_cast %arg1 : i32 to index
    %c0_3 = arith.constant 0 : index
    %9 = vector.load %arg5[%8, %c0_3] : memref<16x128xf32, #tpu.memory_space<vmem>>, vector<1x128xf32>
    tpu.vector_store %arg5[%8, %c0_3], %7 {strides = array<i32>} : memref<16x128xf32, #tpu.memory_space<vmem>>, vector<1x128xf32>,
    return
  }
  func.func @transform_0(%arg0: i32, %arg1: i32, %arg2: memref<16xi32, #tpu.memory_space<smem>>) -> (i32, i32, i32) {
    %c16_i32 = arith.constant 16 : i32
    %0 = arith.muli %arg0, %c16_i32 : i32
    %1 = arith.addi %0, %arg1 : i32
    %2 = arith.index_cast %1 : i32 to index
    %3 = memref.load %arg2[%2] : memref<16xi32, #tpu.memory_space<smem>>
    %c0_i32 = arith.constant 0 : i32
    %c0_i32_0 = arith.constant 0 : i32
    %c0_i32_1 = arith.constant 0 : i32
    return %3, %c0_i32, %c0_i32_0 : i32, i32, i32
  }
  func.func @transform_1(%arg0: i32, %arg1: i32, %arg2: memref<16xi32, #tpu.memory_space<smem>>) -> (i32, i32) {
    %c0_i32 = arith.constant 0 : i32
    %c0_i32_0 = arith.constant 0 : i32
    %c0_i32_1 = arith.constant 0 : i32
    return %c0_i32, %c0_i32_0 : i32, i32
  }
  func.func @transform_2(%arg0: i32, %arg1: i32, %arg2: memref<16xi32, #tpu.memory_space<smem>>) -> (i32, i32) {
    %c0_i32 = arith.constant 0 : i32
    %c0_i32_0 = arith.constant 0 : i32
    return %arg0, %c0_i32 : i32, i32
  }
}

</mosaic_0001>

<bundles_post_ra>
// kernel: tpu_custom_call.1
= control target key start
LH: loop header
LB: loop body
LE: loop exit
PB: predicated region body
PF: predicated region fallthrough
CT: control target
= control target key end

     0   :  { %s767_s0 = inlined_call_operand.hbm [shape: s32[16], index: 0, kind: input, shape index: {}]   ;;  %s768_s1 = inlined_call_operand.hbm [shape: f32[64,1,128], index: 1, kind: input, shape index: {}]   ;;  %s769_s2 = inlined_call_operand.hbm [shape: f32[8,128], index: 2, kind: input, shape index: {}]   ;;  %s770_s3 = inlined_call_operand.hbm [shape: f32[16,128], index: 3, kind: output, shape index: {}]  }
   0x1   :  { %s380_s14 = scalar_lea.hbm %s767_s0, 16 }
   0x2   :  { %p381_p0 = scmp.ne.s32.totalorder %s767_s0, %s380_s14  ;;  %p384_p1 = scmp.lt.u32.totalorder %s380_s14, %s767_s0 }
   0x4   :  { %p386_p2 = pnand %p384_p1, %p381_p0 }
   0x6   :  { %389 = shalt.err (!%p386_p2)  }
   0x7   :  { %s536_s19 = smov [#allocation3]  }
   0x8   :  { %9 = dma.hbm_to_smem %s767_s0, 16, %s536_s19, [#allocation2] }
   0x9   :  { %498 = dma.done.wait [#allocation2], 16 }
   0xa   :  { %499 = vsyncadd [#allocation2], 4294967280 }
   0xb   :  { %11 = sfence }
   0xc   :  { %12 = vsyncpa [#allocation5], 0 }
   0xd   :  { %14 = vsyncpa [#allocation5 + $0x1], 0 }
   0xe   :  { %15 = vsyncpa [#allocation8], 0 }
   0xf   :  { %16 = vsyncpa [#allocation6], 0  ;;  %s574_s22 = smov 0   ;;  %s576_s23 = smov 0  }
  0x10   :  { %s578_s24 = smov 0   ;;  %s580_s25 = smov 0  }
  0x11   :  { %s582_s26 = smov 0   ;;  %s584_s27 = smov 0  }
  0x12 LB: > { %s288_s0 = sadd.s32 4294967295, %s534_s27   ;;  %p60_p3 = scmp.ne.s32.totalorder %s518_s23, %s514_s22  ;;  %s534_s27 = sphi %s584_s27, %s22_s27   ;;  %s530_s26 = sphi %s582_s26, %s790_s26   ;;  %s526_s25 = sphi %s580_s25, %s789_s25   ;;  %s522_s24 = sphi %s578_s24, %s788_s24   ;;  %s518_s23 = sphi %s576_s23, %s787_s23   ;;  %s514_s22 = sphi %s574_s22, %s786_s22  }
  0x13   : > { %p606_p4 = scmp.eq.s32.totalorder %s288_s0, 0  ;;  %p289_p5 = scmp.ge.s32.totalorder %s534_s27, 1 }
  0x14   : > { %p118_p6 = scmp.lt.s32.totalorder %s534_s27, 17  ;;  %s537_s4 = smov [#allocation7]  }
  0x15   : > { %s775_s28 = scalar_select %p606_p4, 1, 0 }
  0x16   : > { %p614_p7 = por %p606_p4, %p60_p3  ;;  %p618_p8 = pnand %p289_p5, %p118_p6 }
  0x17   : > { %s131_s5 = sshll.u32 %s537_s4, 4  ;;  %s31_s7 = sadd.s32 1, %s530_s26  ;;  %s132_s5 = int_to_ptr.vmem [resolvable:$true] %s131_s5 }
  0x18   : > { %s776_s29 = scalar_select %p614_p7, 1, 0 }
  0x19   : > { %s777_s30 = scalar_select %p618_p8, 1, 0 }
  0x1a   : > { %p312_p9 = pneg %p618_p8  ;;  %s632_s8 = sld [smem:[#allocation3 + %s530_s26]] }
  0x1b   : > { %p634_p11 = scmp.ge.s32.totalorder %s31_s7, 16  ;;  %s390_s12 = scalar_lea.hbm %s769_s2, 128 }
  0x1c   : > { %p626_p10 = pnand %p312_p9, %p606_p4  ;;  %p391_p12 = scmp.ne.s32.totalorder %s769_s2, %s390_s12 }
  0x1d   : > { %s779_s9 = scalar_select %p634_p11, 1, 0 }
  0x1e   : > { %p392_p13 = pneg %p626_p10  ;;  %p397_p2 = scmp.lt.u32.totalorder %s390_s12, %s769_s2 }
  0x20   : > { %p393_p0 = pnand %p392_p13, %p391_p12 }
  0x22   : > { %p394_p1 = pneg %p393_p0 }
  0x24   : > { %p399_p3 = pnand %p397_p2, %p394_p1 }
  0x26   : > { %402 = shalt.err (!%p399_p3)
}
  0x27   : > { %s403_s17 = scalar_lea.vmem %s132_s5, 128  ;;  %p411_p4 = scmp.lt.s32.totalorder %s132_s5, %s132_s5 }
  0x28   : > { %p404_p5 = scmp.ne.s32.totalorder %s132_s5, %s403_s17  ;;  %p412_p7 = scmp.lt.s32.totalorder %s403_s17, %s403_s17 }
  0x2a   : > { %p406_p6 = pnand %p404_p5, %p392_p13  ;;  %p413_p8 = por %p412_p7, %p411_p4 }
  0x2c   : > { %p407_p9 = pneg %p406_p6 }
  0x2e   : > { %p414_p11 = pnand %p413_p8, %p407_p9 }
  0x30   : > { %417 = shalt.err (!%p414_p11)
}
  0x31   : > { %315 = dma.hbm_to_vmem [thread:$0]  (!%p626_p10), %s769_s2, 128, %s132_s5, [#allocation8]  }
  0x32   : > { %p780_p12 = scmp.ne.s32.totalorder %s779_s9, 0  ;;  %p54_p4 = scmp.ne.s32.totalorder %s522_s24, %s518_s23 }
  0x33   : > { %p55_p7 = scmp.eq.s32.totalorder %s534_s27, 0  ;;  %p323_p11 = scmp.lt.s32.totalorder %s534_s27, 16 }
  0x34   : > { %s792_s7 = smov (%p780_p12, %s31_s7), 0  ;;  %s47_s6 = sadd.s32 1, %s522_s24 }
  0x35   : > { %s43_s20 = sld [smem:[#allocation3 + %s792_s7]]  ;;  %p56_p8 = por %p55_p7, %p54_p4 }
  0x36   : > { %s142_s10 = sand.u32 1, %s522_s24  }
  0x37   : > { %s302_s21 = scalar_select %p56_p8, [#allocation3], [#allocation10] }
  0x38   : > { %s303_s22 = scalar_select %p56_p8, %s530_s26, 0 }
  0x39   : > { %s794_s21 = smov (!%p323_p11, %s302_s21), [#allocation11]  ;;  %p670_p10 = pnand %p323_p11, %p56_p8 }
  0x3a   : > { %s796_s22 = smov (!%p323_p11, %s303_s22), 0  ;;  %s145_s12 = scalar_lea.vmem [#allocation4], %s142_s10 }
  0x3b   : > { %s44_s4 = ssub.s32 %s632_s8, %s43_s20  ;;  %s148_s9 = sld [smem:[%s794_s21 + %s796_s22]] }
  0x3c   : > { %p45_p13 = scmp.eq.s32.totalorder %s44_s4, 0  ;;  %s155_s13 = sshll.u32 %s145_s12, 4  ;;  %s674_s13 = int_to_ptr.vmem [resolvable:$true] %s155_s13 }
  0x3d   : > { %s143_s17 = scalar_lea.sflag [#allocation5], %s142_s10  ;;  %p420_p1 = pneg %p670_p10 }
  0x3e   : > { %s668_s11 = scalar_select %p45_p13, %s522_s24, %s47_s6  }
  0x3f   : > { %s423_s21 = scalar_lea.hbm %s768_s1, 1024 }
  0x41   : > { %s292_s14 = sshll.u32 %s148_s9, 4 }
  0x42   : > { %s679_s16 = scalar_lea.hbm %s768_s1, %s292_s14 }
  0x43   : > { %s418_s18 = scalar_lea.hbm %s679_s16, 16  ;;  %p424_p5 = scmp.lt.u32.totalorder %s679_s16, %s768_s1 }
  0x44   : > { %p419_p0 = scmp.ne.s32.totalorder %s679_s16, %s418_s18  ;;  %p425_p6 = scmp.lt.u32.totalorder %s423_s21, %s418_s18 }
  0x45   : > { %p427_p12 = scmp.lt.u32.totalorder %s418_s18, %s679_s16 }
  0x46   : > { %p421_p2 = pnand %p420_p1, %p419_p0  ;;  %p426_p9 = por %p425_p6, %p424_p5 }
  0x48   : > { %p422_p3 = pneg %p421_p2  ;;  %p428_p4 = por %p427_p12, %p426_p9 }
  0x4a   : > { %p429_p7 = pnand %p428_p4, %p422_p3 }
  0x4c   : > { %432 = shalt.err (!%p429_p7)
}
  0x4d   : > { %s433_s6 = scalar_lea.vmem %s674_s13, 16  ;;  %s538_s10 = smov [#allocation4]  }
  0x4e   : > { %p434_p8 = scmp.ne.s32.totalorder %s674_s13, %s433_s6  ;;  %s438_s9 = sshll.u32 %s538_s10, 4  ;;  %s439_s9 = int_to_ptr.vmem [resolvable:$false] %s438_s9 }
  0x4f   : > { %s440_s12 = scalar_lea.vmem %s439_s9, 32  ;;  %p441_p0 = scmp.lt.s32.totalorder %s674_s13, %s439_s9 }
  0x50   : > { %p436_p11 = pnand %p434_p8, %p420_p1  ;;  %p442_p2 = scmp.lt.s32.totalorder %s440_s12, %s433_s6 }
  0x52   : > { %p437_p13 = pneg %p436_p11  ;;  %p443_p5 = por %p442_p2, %p441_p0 }
  0x54   : > { %p444_p6 = pnand %p443_p5, %p437_p13 }
  0x56   : > { %447 = shalt.err (!%p444_p6)
}
  0x57   : > { %321 = dma.hbm_to_vmem [thread:$0]  (!%p670_p10), %s679_s16, 16, %s674_s13, %s143_s17  }
  0x58   : > { %p782_p3 = scmp.ne.s32.totalorder %s777_s30, 0 }
  0x59   : > { %s166_s14 = sand.u32 (!%p782_p3), 1, %s518_s23   ;;  %p783_p1 = scmp.ne.s32.totalorder (!%p782_p3), %s776_s29, 0 }
  0x5a   : > { %164 = sbr.rel (%p782_p3) target bundleno = 130 (0x82), region = 28  ;;  %s167_s8 = scalar_lea.sflag (!%p782_p3), [#allocation5], %s166_s14 }
  0x5b   : > { %s169_s15 = scalar_lea.vmem (!%p782_p3), [#allocation4], %s166_s14 }
  0x61   : > { %501 = dma.done.wait (%p783_p1), %s167_s8, 16  }
  0x62   : > { %503 = vsyncadd (%p783_p1), %s167_s8, 4294967280  ;;  %p784_p9 = scmp.ne.s32.totalorder %s775_s28, 0 }
  0x64   : > { %505 = dma.done.wait (%p784_p9), [#allocation8], 128  }
  0x65   : > { %507 = vsyncadd (%p784_p9), [#allocation8], 4294967168  ;;  %p194_p10 = scmp.lt.s32.totalorder %s526_s25, 0  ;;  %s195_s30 = ssub.s32 0, %s526_s25  ;;  %v200_v0 = vld [vmem:[%s169_s15] sm:$0x1] }
  0x66   : > { %s295_s5 = smin.u32 %s526_s25, %s195_s30  ;;  %s539_s17 = smov [#allocation9]  }
  0x67   : > { %s197_s13 = sand.u32 7, %s295_s5   ;;  %s215_s29 = sshll.u32 %s539_s17, 4  ;;  %s216_s29 = int_to_ptr.vmem [resolvable:$true] %s215_s29 }
  0x68   : > { %s198_s16 = ssub.s32 0, %s197_s13  ;;  %p722_p12 = scmp.eq.s32.totalorder %s288_s0, 15 }
  0x69   : > { %s798_s16 = smov (!%p194_p10, %s198_s16), %s197_s13  ;;  %s204_s19 = scalar_lea.vmem [#allocation9], %s526_s25 }
  0x6a   : > { %s201_s18 = scalar_lea.vmem [#allocation7], %s798_s16  ;;  %s448_s20 = scalar_lea.vmem %s216_s29, 256 }
  0x6b   : > { %v202_v1 = vld [vmem:[%s201_s18] sm:$0x1]  ;;  %p449_p4 = scmp.ne.s32.totalorder %s216_s29, %s448_s20  ;;  %p455_p11 = scmp.lt.s32.totalorder %s216_s29, %s216_s29 }
  0x6c   : > { %v203_v2 = vadd.f32 %v202_v1, %v200_v0  ;;  %p456_p13 = scmp.lt.s32.totalorder %s448_s20, %s448_s20 }
  0x6d   : > { %p450_p7 = pnand %p449_p4, %p722_p12 }
  0x6e   : > { %205 = vst [vmem:[%s204_s19] sm:$0x1] %v203_v2  ;;  %p457_p0 = por %p456_p13, %p455_p11 }
  0x6f   : > { %p451_p8 = pneg %p450_p7 }
  0x71   : > { %p458_p2 = pnand %p457_p0, %p451_p8 }
  0x73   : > { %461 = shalt.err (!%p458_p2)
}
  0x74   : > { %s462_s22 = scalar_lea.hbm %s770_s3, 256 }
  0x75   : > { %p463_p5 = scmp.ne.s32.totalorder %s770_s3, %s462_s22  ;;  %p468_p1 = scmp.lt.u32.totalorder %s462_s22, %s770_s3 }
  0x77   : > { %p464_p6 = pnand %p463_p5, %p722_p12 }
  0x79   : > { %p465_p3 = pneg %p464_p6 }
  0x7b   : > { %p470_p9 = pnand %p468_p1, %p465_p3 }
  0x7d   : > { %473 = shalt.err (!%p470_p9)
}
  0x7e   : > { %s540_s9 = smov 128   ;;  %s541_s12 = smov 8  }
  0x7f   : > { %309 = dma.vmem_to_hbm [thread:$0]  (%p722_p12), %s216_s29, 256, %s770_s3, [#allocation6], %s540_s9, %s540_s9, %s541_s12  }
  0x80   : > { %509 = dma.done.wait (%p722_p12), [#allocation6], 256  }
  0x81   : > { %511 = vsyncadd (%p722_p12), [#allocation6], 4294967040 }
  0x82 PF: > { %s22_s27 = sadd.s32 1, %s534_s27   ;;  %s786_s22 = smov %s518_s23 }
  0x83   : > { %p19_p10 = scmp.ge.s32.totalorder %s22_s27, 18   ;;  %s787_s23 = smov %s522_s24 }
  0x84   : > { %s788_s24 = smov %s668_s11  ;;  %s789_s25 = smov %s530_s26 }
  0x85   : > { %s790_s26 = smov %s792_s7  ;;  %21 = sbr.rel (!%p19_p10) target bundleno = 18 (0x12), region = 72 }
  0x8c   :  { %231 = vsyncpa [#allocation5], 1 }
  0x8d   :  { %233 = vsyncpa [#allocation5 + $0x1], 1 }
  0x8e   :  { %234 = vsyncpa [#allocation8], 1 }
  0x8f   :  { %235 = vsyncpa [#allocation6], 1 }
  0x90   :  { %237 = vsyncpa [#allocation6 + $0x1], 1 }

</bundles_post_ra>
